<compile_context>
chip_gen: v7x
topology: tpu7x:2x2x1
jax: 0.10.0
libtpu: 0.0.40
codegen_flags: <defaults>
</compile_context>

<pallas_src>
import functools

import jax
import jax.numpy as jnp
from jax.experimental import pallas as pl
from jax.experimental.pallas import tpu as pltpu


def _sse_kernel(x_ref, w_ref, b_ref, o_ref, *, use_mxu):
    # x_ref: (C, TP) tile of one image's (C, HW) slab (VMEM)
    # w_ref: (1, C) if use_mxu else (C, 1) BN-folded 1x1-conv weight (VMEM)
    # b_ref: (1,)   BN-folded bias (SMEM scalar)
    # o_ref: (1, TP) output tile
    x = x_ref[...]  # keep native dtype; accumulate in f32 below
    if use_mxu:
        # (1, C) @ (C, TP) on the MXU with f32 accumulation.
        s = jnp.dot(w_ref[...], x, preferred_element_type=jnp.float32)
    else:
        # Small C: VPU broadcast-multiply + sublane reduction, f32 accumulate.
        s = jnp.sum(x * w_ref[...], axis=0, keepdims=True, dtype=jnp.float32)
    s = s + b_ref[0]
    o_ref[...] = jax.nn.sigmoid(s).astype(o_ref.dtype)


def _pick_tile_hw(hw, c, itemsize,
                  x_budget_bytes=16 * 1024 * 1024, max_tile=8192):
    """Largest lane tile: a multiple of 128 (or full HW) within the VMEM budget."""
    cap = max(128, x_budget_bytes // (2 * max(c, 1) * itemsize))  # 2x: dbl-buffer
    cap = min(cap, max_tile)
    if hw <= cap:
        return hw                      # full-extent block, no padding
    return max(128, (cap // 128) * 128)


@jax.jit
def sse_forward(x_nchw, conv_w, bn_gamma, bn_beta, bn_mean, bn_var, eps=1e-5):
    """x_nchw: (N, C, H, W). Returns (N, 1, H, W) sigmoid attention map."""
    N, C, H, W = x_nchw.shape
    HW = H * W
    dtype = x_nchw.dtype
    itemsize = jnp.dtype(dtype).itemsize

    # Fold BatchNorm (eval-mode running stats) into the 1x1 conv:
    #   z = sum_c w[c]*x[c];  y = gamma*(z - mean)/sqrt(var+eps) + beta
    scale = bn_gamma / jnp.sqrt(bn_var + eps)                 # scalar (1 out-ch)
    w_flat = (conv_w.reshape(C) * scale).astype(dtype)        # (C,)
    b_eff = (bn_beta - bn_mean * scale).reshape(1).astype(jnp.float32)

    use_mxu = C >= 128
    w_eff = w_flat.reshape(1, C) if use_mxu else w_flat.reshape(C, 1)
    w_spec = (pl.BlockSpec((1, C), lambda n, p: (0, 0)) if use_mxu
              else pl.BlockSpec((C, 1), lambda n, p: (0, 0)))

    # (N, C, H, W) -> (N, C, HW): pure reshape, no HBM transpose pass.
    x = x_nchw.reshape(N, C, HW)

    tile_hw = _pick_tile_hw(HW, C, itemsize)
    grid = (N, pl.cdiv(HW, tile_hw))

    out = pl.pallas_call(
        functools.partial(_sse_kernel, use_mxu=use_mxu),
        out_shape=jax.ShapeDtypeStruct((N, 1, HW), dtype),
        grid_spec=pltpu.PrefetchScalarGridSpec(
            num_scalar_prefetch=0,
            grid=grid,
            in_specs=[
                # x tile: batch dim squeezed, channels full, pixels tiled.
                pl.BlockSpec((None, C, tile_hw), lambda n, p: (n, 0, p)),
                # folded weight: tiny, constant across the grid (VMEM).
                w_spec,
                # folded bias: scalar in SMEM.
                pl.BlockSpec(memory_space=pltpu.MemorySpace.SMEM),
            ],
            out_specs=pl.BlockSpec((None, 1, tile_hw), lambda n, p: (n, 0, p)),
        ),
        compiler_params=pltpu.CompilerParams(
            dimension_semantics=("parallel", "parallel"),
            vmem_limit_bytes=32 * 1024 * 1024,
        ),
    )(x, w_eff, b_eff)

    # (N, 1, HW) -> (N, 1, H, W): free reshape.
    return out.reshape(N, 1, H, W)


if __name__ == "__main__":
    key = jax.random.PRNGKey(0)
    k_x, k_w, k_g, k_b, k_m, k_v = jax.random.split(key, 6)

    N, C, H, W = 2, 4, 16, 16
    x = jax.random.normal(k_x, (N, C, H, W), dtype=jnp.float32)

    # Conv2d(C -> 1, k=1, bias=False): weight shape (1, C, 1, 1)
    conv_w = jax.random.normal(k_w, (1, C, 1, 1), dtype=jnp.float32) * 0.5
    # BatchNorm2d(1) parameters / running stats (deterministic synthetic init)
    bn_gamma = 1.0 + 0.1 * jax.random.normal(k_g, (1,), dtype=jnp.float32)
    bn_beta = 0.1 * jax.random.normal(k_b, (1,), dtype=jnp.float32)
    bn_mean = 0.1 * jax.random.normal(k_m, (1,), dtype=jnp.float32)
    bn_var = jnp.abs(jax.random.normal(k_v, (1,), dtype=jnp.float32)) + 0.5

    y = sse_forward(x, conv_w, bn_gamma[0], bn_beta[0], bn_mean[0], bn_var[0])
    y = jax.block_until_ready(y)

    # Pure-JAX reference check.
    scale = bn_gamma[0] / jnp.sqrt(bn_var[0] + 1e-5)
    z = jnp.einsum("nchw,c->nhw", x, conv_w.reshape(C))
    ref = jax.nn.sigmoid(scale * (z - bn_mean[0]) + bn_beta[0])[:, None, :, :]
    assert y.shape == (N, 1, H, W)
    assert jnp.allclose(y, ref, atol=1e-5, rtol=1e-5)

    print("KERNEL_OK")
</pallas_src>

<mosaic_0001>
module attributes {stable_mosaic.version = 11 : i64} {
  func.func @_sse_kernel(%arg0: i32, %arg1: i32, %arg2: memref<1x4x256xf32, #tpu.memory_space<vmem>>, %arg3: memref<4x1xf32, #tpu.memory_space<vmem>>, %arg4: memref<1xf32, #tpu.memory_space<smem>>, %arg5: memref<1x1x256xf32, #tpu.memory_space<vmem>>) attributes {dimension_semantics = [#tpu.dimension_semantics<parallel>, #tpu.dimension_semantics<parallel>], iteration_bounds = array<i64: 2, 1>, scalar_prefetch = 0 : i64, scratch_operands = 0 : i64, tpu.core_type = #tpu.core_type<tc>, window_params = [{transform_indices = @transform_0, window_bounds = array<i64: 1, 4, 256>}, {pipeline_mode = #tpu.pipeline_mode<synchronous>, transform_indices = @transform_1, window_bounds = array<i64: 4, 1>}, {transform_indices = @transform_2, window_bounds = array<i64: 1>}, {transform_indices = @transform_3, window_bounds = array<i64: 1, 1, 256>}]} {
    %c0 = arith.constant 0 : index
    %c0_0 = arith.constant 0 : index
    %c0_1 = arith.constant 0 : index
    %0 = vector.load %arg2[%c0, %c0_0, %c0_1] : memref<1x4x256xf32, #tpu.memory_space<vmem>>, vector<1x4x256xf32>
    %1 = vector.shape_cast %0 : vector<1x4x256xf32> to vector<4x256xf32>
    %c0_2 = arith.constant 0 : index
    %c0_3 = arith.constant 0 : index
    %2 = vector.load %arg3[%c0_2, %c0_3] : memref<4x1xf32, #tpu.memory_space<vmem>>, vector<4x1xf32>
    %3 = vector.broadcast %2 : vector<4x1xf32> to vector<4x256xf32>
    %4 = arith.mulf %1, %3 : vector<4x256xf32>
    %cst = arith.constant dense<0.000000e+00> : vector<256xf32>
    %5 = vector.multi_reduction <add>, %4, %cst [0] : vector<4x256xf32> to vector<256xf32>
    %6 = vector.shape_cast %5 : vector<256xf32> to vector<1x256xf32>
    %c0_4 = arith.constant 0 : index
    %7 = memref.load %arg4[%c0_4] : memref<1xf32, #tpu.memory_space<smem>>
    %8 = vector.broadcast %7 : f32 to vector<1x256xf32>
    %9 = arith.addf %6, %8 : vector<1x256xf32>
    %10 = arith.negf %9 : vector<1x256xf32>
    %11 = math.exp %10 : vector<1x256xf32>
    %cst_5 = arith.constant 1.000000e+00 : f32
    %12 = vector.broadcast %cst_5 : f32 to vector<1x256xf32>
    %13 = arith.addf %12, %11 : vector<1x256xf32>
    %14 = arith.divf %12, %13 : vector<1x256xf32>
    %c0_6 = arith.constant 0 : index
    %c0_7 = arith.constant 0 : index
    %c0_8 = arith.constant 0 : index
    %15 = vector.load %arg5[%c0_6, %c0_7, %c0_8] : memref<1x1x256xf32, #tpu.memory_space<vmem>>, vector<1x1x256xf32>
    %16 = vector.shape_cast %15 : vector<1x1x256xf32> to vector<1x256xf32>
    %17 = vector.shape_cast %14 : vector<1x256xf32> to vector<1x1x256xf32>
    tpu.vector_store %arg5[%c0_6, %c0_7, %c0_8], %17 {strides = array<i32>} : memref<1x1x256xf32, #tpu.memory_space<vmem>>, vector<1x1x256xf32>,
    return
  }
  func.func @transform_0(%arg0: i32, %arg1: i32) -> (i32, i32, i32) {
    %c0_i32 = arith.constant 0 : i32
    %c0_i32_0 = arith.constant 0 : i32
    return %arg0, %c0_i32, %arg1 : i32, i32, i32
  }
  func.func @transform_1(%arg0: i32, %arg1: i32) -> (i32, i32) {
    %c0_i32 = arith.constant 0 : i32
    %c0_i32_0 = arith.constant 0 : i32
    %c0_i32_1 = arith.constant 0 : i32
    return %c0_i32, %c0_i32_0 : i32, i32
  }
  func.func @transform_2(%arg0: i32, %arg1: i32) -> i32 {
    %c0_i32 = arith.constant 0 : i32
    %c0_i32_0 = arith.constant 0 : i32
    return %c0_i32 : i32
  }
  func.func @transform_3(%arg0: i32, %arg1: i32) -> (i32, i32, i32) {
    %c0_i32 = arith.constant 0 : i32
    %c0_i32_0 = arith.constant 0 : i32
    return %arg0, %c0_i32, %arg1 : i32, i32, i32
  }
}

</mosaic_0001>

<bundles_post_ra>
// kernel: sse_forward.1
= control target key start
LH: loop header
LB: loop body
LE: loop exit
PB: predicated region body
PF: predicated region fallthrough
CT: control target
= control target key end

     0   :  { %s461_s14 = smov 0   ;;  %s463_s15 = smov 0   ;;  %s501_s0 = inlined_call_operand.vmem [shape: f32[2,4,256], index: 0, kind: input, shape index: {}]   ;;  %s502_s1 = inlined_call_operand.vmem [shape: f32[4,1], index: 1, kind: input, shape index: {}]   ;;  %s503_s2 = inlined_call_operand.<no memory space> [shape: f32[1], index: 2, kind: input, shape index: {}]   ;;  %s504_s3 = inlined_call_operand.vmem [shape: f32[2,1,256], index: 3, kind: output, shape index: {}]  }
   0x1   :  { %8 = sst [smem:[#allocation2]] %s503_s2  ;;  %s465_s16 = smov 0  }
   0x2 LB: > { %s26_s2 = sadd.s32 1, %s429_s15  ;;  %p366_p0 = scmp.ge.s32.totalorder %s433_s16, 1  ;;  %s433_s16 = sphi %s465_s16, %s14_s16   ;;  %s429_s15 = sphi %s463_s15, %s506_s15   ;;  %s425_s14 = sphi %s461_s14, %s505_s14  }
   0x3   : > { %p28_p1 = scmp.ge.s32.totalorder %s26_s2, 2  ;;  %p159_p2 = scmp.lt.s32.totalorder %s433_s16, 3 }
   0x5   : > { %s508_s2 = smov (%p28_p1, %s26_s2), 0  ;;  %p160_p3 = pnand %p366_p0, %p159_p2 }
   0x6   : > { %v210_v0 = vld [vmem:[%s502_s1] sm:$0xf] (!%p160_p3)  ;;  %v435_v1 = vmov (!%p160_p3), 0   ;;  %p191_p4 = scmp.lt.s32.totalorder (!%p160_p3), %s425_s14, 1  ;;  %v436_v2 = vmov (!%p160_p3), 839922192   ;;  %v218_v4 = vlaneseq (!%p160_p3) }
   0x7   : > { %163 = sbr.rel (%p160_p3) target bundleno = 190 (0xbe), region = 32  ;;  %402 = vset.pattern.permute.xlu0 (!%p160_p3), %v435_v1  ;;  %v216_v3 = vunpack.c.l.s4 (!%p160_p3), %v436_v2  ;;  %vm227_vm0 = vcmask (!%p160_p3), 1043456   ;;  %s242_s23 = sld [smem:[#allocation2]] (!%p160_p3)  ;;  %v437_v36 = vmov (!%p160_p3), 1966171168  }
   0x8   : > { %213 = vperm.xlu0 (!%p160_p3), %402, %v210_v0   ;;  %v219_v6 = vshrl.u32 (!%p160_p3), %v218_v4, 7  ;;  %v262_v37 = vunpack.c.l.s4 (!%p160_p3), %v437_v36  ;;  %vm278_vm1 = vcmp.lt.s32.totalorder (!%p160_p3), %v218_v4, 256 }
   0x9   : > { %v217_v5 = vunpack.c.0.s8 (!%p160_p3), %v216_v3 }
   0xa   : > { %v263_v38 = vunpack.c.0.s8 (!%p160_p3), %v262_v37 }
   0xb   : > { %v220_v7 = vsub.s32 (!%p160_p3), %v217_v5, %v219_v6 }
   0xc   : > { %v266_v40 = vsub.s32 (!%p160_p3), %v263_v38, %v219_v6 }
   0xd   : > { %v243_v24 = vstv (!%p160_p3), %s242_s23 }
   0xe   : > { %s510_s14 = smov (!%p191_p4, %s425_s14), 1 }
   0xf   : > { %s374_s19 = sshll.u32 %s510_s14, 3  ;;  %s369_s24 = sshll.u32 %s510_s14, 1 }
  0x10   : > { %s198_s22 = scalar_lea.vmem %s501_s0, %s374_s19  ;;  %s207_s27 = scalar_lea.vmem %s504_s3, %s369_s24 }
  0x11   : > { %v209_v9 = vld [vmem:[%s198_s22] sm:$0xff] }
  0x87   : > { %v214_v8 = vpop.permute.xlu0 %213 }
  0x88   : > { %v221_v10 = vrot.slane %v214_v8, %v220_v7 }
  0x8a   : > { %v223_v11 = vmul.f32 %v221_v10, %v209_v9 }
  0x8c   : > { %v225_v12 = vcombine.high %v223_v11, %v223_v11  ;;  %v228_v13 = vsel %vm227_vm0, %v223_v11, 0.0 }
  0x8d   : > { %v229_v14 = vrot.slane %v228_v13, 4 }
  0x8e   : > { %v235_v15 = vsel %vm227_vm0, %v225_v12, 0.0 }
  0x8f   : > { %v230_v16 = vadd.f32 %v229_v14, %v228_v13  ;;  %v236_v17 = vrot.slane %v235_v15, 4 }
  0x91   : > { %v231_v18 = vrot.slane %v230_v16, 2  ;;  %v237_v19 = vadd.f32 %v236_v17, %v235_v15 }
  0x93   : > { %v232_v20 = vadd.f32 %v231_v18, %v230_v16  ;;  %v238_v21 = vrot.slane %v237_v19, 2 }
  0x95   : > { %v233_v22 = vrot.slane %v232_v20, 1  ;;  %v239_v23 = vadd.f32 %v238_v21, %v237_v19 }
  0x97   : > { %v234_v25 = vadd.f32 %v233_v22, %v232_v20  ;;  %v240_v26 = vrot.slane %v239_v23, 1 }
  0x99   : > { %v241_v27 = vadd.f32 %v240_v26, %v239_v23  ;;  %v244_v28 = vadd.f32 %v243_v24, %v234_v25 }
  0x9b   : > { %v245_v29 = vadd.f32 %v243_v24, %v241_v27  ;;  %v370_v30 = vmul.f32 -1.442695, %v244_v28 }
  0x9d   : > { %403 = vpow2.f32 %v370_v30  ;;  %v371_v31 = vmul.f32 -1.442695, %v245_v29 }
  0x9f   : > { %405 = vpow2.f32 %v371_v31 }
  0xa7   : > { %v404_v32 = vpop.eup %403 }
  0xa8   : > { %v252_v33 = vadd.f32 1.0, %v404_v32 }
  0xa9   : > { %v406_v34 = vpop.eup %405 }
  0xaa   : > { %v253_v35 = vadd.f32 1.0, %v406_v34  ;;  %407 = vrcp.f32 %v252_v33 }
  0xac   : > { %409 = vrcp.f32 %v253_v35 }
  0xb4   : > { %v408_v39 = vpop.eup %407 }
  0xb6   : > { %v410_v41 = vpop.eup %409 }
  0xb7   : > { %v260_v42 = vcombine.low %v408_v39, %v410_v41 }
  0xb9   : > { %v267_v43 = vrot.slane %v260_v42, %v266_v40 }
  0xbb   : > { %v274_v44 = vrot.slane %v267_v43, %v266_v40 }
  0xbd   : > { %280 = vst.msk [vmem:[%s207_s27] sm:$0x3] %vm278_vm1, %v274_v44 }
  0xbe PF: > { %s14_s16 = sadd.s32 1, %s433_s16   ;;  %s505_s14 = smov %s429_s15 }
  0xbf   : > { %p11_p5 = scmp.ge.s32.totalorder %s14_s16, 4   ;;  %s506_s15 = smov %s508_s2 }
  0xc1   :  { %13 = sbr.rel (!%p11_p5) target bundleno = 2 (0x2), region = 62 }

</bundles_post_ra>
